<compile_context>
chip_gen: v6e
topology: v6e:2x2x1
jax: 0.10.0
libtpu: 0.0.40
codegen_flags: <defaults>
</compile_context>

<pallas_src>
import functools

import jax
import jax.numpy as jnp
import numpy as np
from jax import lax
from jax.experimental import pallas as pl
from jax.experimental.pallas import tpu as pltpu


def _dsconv_kernel(x_ref, wdt_ref, wblk_ref, bpt_ref, o_ref, xp_scr, acc_scr,
                   *, NB, H, W, Cin):
    # x_ref:    (NB*H, W*Cin)      lane-packed NHWC input, NB images stacked on rows
    # wdt_ref:  (9, W*Cin)         depthwise 3x3 weights, tiled W times along lanes
    # wblk_ref: (W*Cin, W*Cout)    block-diagonal pointwise weight (W copies of (Cin,Cout))
    # bpt_ref:  (1, W*Cout)        folded bias (bp + bd @ Wp), tiled W times
    # o_ref:    (NB*H, W*Cout)     lane-packed output slab
    # xp_scr:   (H+2, (W+2)*Cin)   zero-padded single-image staging buffer
    # acc_scr:  (NB*H, W*Cin) f32  depthwise results for the whole slab

    # Zero ONLY the 1-pixel halo ring, once per grid step (amortized over the
    # NB images in this slab).  The interior is fully overwritten per image, so
    # the ring is all that must be guaranteed zero.
    xp_scr[0:1, :] = jnp.zeros((1, (W + 2) * Cin), xp_scr.dtype)
    xp_scr[H + 1:H + 2, :] = jnp.zeros((1, (W + 2) * Cin), xp_scr.dtype)
    xp_scr[:, 0:Cin] = jnp.zeros((H + 2, Cin), xp_scr.dtype)
    xp_scr[:, (W + 1) * Cin:(W + 2) * Cin] = jnp.zeros((H + 2, Cin), xp_scr.dtype)

    # Load the 9 depthwise weight rows once per grid step.
    w_taps = [wdt_ref[i:i + 1, :] for i in range(9)]

    def per_image(b, carry):
        row0 = b * H
        if H % 8 == 0:
            row0 = pl.multiple_of(row0, 8)
        # Stage this image into the padded buffer (interior only).
        xp_scr[pl.ds(1, H), pl.ds(Cin, W * Cin)] = x_ref[pl.ds(row0, H), :]
        # Depthwise 3x3 (cross-correlation, matching nn.Conv2d): 9 shifted
        # lane-packed MACs on the VPU, accumulated in f32.
        acc = jnp.zeros((H, W * Cin), jnp.float32)
        for kh in range(3):
            for kw in range(3):
                tap = xp_scr[pl.ds(kh, H), pl.ds(kw * Cin, W * Cin)]
                acc = acc + tap.astype(jnp.float32) * w_taps[kh * 3 + kw]
        acc_scr[pl.ds(row0, H), :] = acc
        return carry

    lax.fori_loop(0, NB, per_image, 0, unroll=True)

    # Pointwise 1x1 conv for the WHOLE slab as one lane-packed MXU matmul.
    # The folded bias already carries the depthwise-bias contribution.
    out = jnp.dot(acc_scr[...], wblk_ref[...], preferred_element_type=jnp.float32)
    out = out + bpt_ref[...]
    o_ref[...] = out.astype(o_ref.dtype)


def pack_params(wd, bd, wp, bp, W):
    """One-time re-layout of the PyTorch-format weights (call once at init).

    Args:
      wd: (Cin, 1, 3, 3) depthwise weight, bd: (Cin,) depthwise bias,
      wp: (Cout, Cin, 1, 1) pointwise weight, bp: (Cout,) pointwise bias,
      W:  spatial width the activations will have.
    Returns:
      (wdt, wblk, bpt) packed tensors ready for dsconv_apply.
    """
    Cin = wd.shape[0]
    # Depthwise weights: (Cin,1,3,3) -> (3,3,Cin) -> (9,Cin), tiled along W.
    wd_k = jnp.transpose(wd[:, 0, :, :], (1, 2, 0)).reshape(9, Cin).astype(jnp.float32)
    wdt = jnp.tile(wd_k, (1, W))                                     # (9, W*Cin)
    # Pointwise weights: (Cout,Cin,1,1) -> (Cin,Cout); block-diagonal expand so
    # the packed matmul applies Wp independently at every pixel column.
    wp_k = jnp.transpose(wp[:, :, 0, 0], (1, 0)).astype(jnp.float32)  # (Cin, Cout)
    wblk = jnp.kron(jnp.eye(W, dtype=jnp.float32), wp_k)              # (W*Cin, W*Cout)
    # Fold depthwise bias into pointwise bias: (dw+bd)@Wp+bp == dw@Wp+(bd@Wp+bp).
    bp_fold = bp.astype(jnp.float32) + bd.astype(jnp.float32) @ wp_k  # (Cout,)
    bpt = jnp.tile(bp_fold, W).reshape(1, W * wp.shape[0])            # (1, W*Cout)
    return wdt, wblk, bpt


def _choose_nb(N, H):
    """Images per grid step: aim for ~256 rows in the matmul M dimension while
    keeping >=2 grid steps so megacore / 2-TC chips can shard the batch axis."""
    target = max(1, 256 // H)
    cap = max(1, N // 2) if N > 1 else 1
    best = 1
    for nb in range(1, min(target, cap, N) + 1):
        if N % nb == 0:
            best = nb
    return best


@jax.jit
def dsconv_apply(x_nchw, wdt, wblk, bpt):
    """Hot path: NCHW activations -> lane-packed slab -> pallas_call -> NCHW.

    Weights must come pre-packed from pack_params (no per-call re-layout).
    """
    N, Cin, H, W = x_nchw.shape
    Cout = wblk.shape[1] // W
    NB = _choose_nb(N, H)

    # NCHW -> NHWC -> lane-packed (N*H, W*Cin) slab (fused under jit).
    x_pk = jnp.transpose(x_nchw, (0, 2, 3, 1)).reshape(N * H, W * Cin)

    kernel = functools.partial(_dsconv_kernel, NB=NB, H=H, W=W, Cin=Cin)

    out_pk = pl.pallas_call(
        kernel,
        out_shape=jax.ShapeDtypeStruct((N * H, W * Cout), x_nchw.dtype),
        grid_spec=pltpu.PrefetchScalarGridSpec(
            num_scalar_prefetch=0,
            grid=(N // NB,),
            in_specs=[
                pl.BlockSpec((NB * H, W * Cin), lambda g: (g, 0)),
                pl.BlockSpec((9, W * Cin), lambda g: (0, 0)),
                pl.BlockSpec((W * Cin, W * Cout), lambda g: (0, 0)),
                pl.BlockSpec((1, W * Cout), lambda g: (0, 0)),
            ],
            out_specs=pl.BlockSpec((NB * H, W * Cout), lambda g: (g, 0)),
            scratch_shapes=[
                pltpu.VMEM((H + 2, (W + 2) * Cin), x_nchw.dtype),
                pltpu.VMEM((NB * H, W * Cin), jnp.float32),
            ],
        ),
        compiler_params=pltpu.CompilerParams(
            dimension_semantics=("parallel",)),
    )(x_pk, wdt, wblk, bpt)

    # (N*H, W*Cout) -> (N, H, W, Cout) -> NCHW.
    return jnp.transpose(out_pk.reshape(N, H, W, Cout), (0, 3, 1, 2))


def depthwise_separable_conv(x_nchw, wd, bd, wp, bp):
    """Convenience wrapper matching the PyTorch module signature.

    Packs weights on every call; for repeated calls, call pack_params once and
    reuse dsconv_apply directly.
    """
    W = x_nchw.shape[3]
    return dsconv_apply(x_nchw, *pack_params(wd, bd, wp, bp, W))


def _reference(x, wd, bd, wp, bp):
    """Pure-JAX reference using lax convs (PyTorch semantics)."""
    Cin = x.shape[1]
    dw = jax.lax.conv_general_dilated(
        x, wd, window_strides=(1, 1), padding=((1, 1), (1, 1)),
        dimension_numbers=("NCHW", "OIHW", "NCHW"),
        feature_group_count=Cin) + bd.reshape(1, -1, 1, 1)
    pw = jax.lax.conv_general_dilated(
        dw, wp, window_strides=(1, 1), padding="VALID",
        dimension_numbers=("NCHW", "OIHW", "NCHW")) + bp.reshape(1, -1, 1, 1)
    return pw


if __name__ == "__main__":
    N, Cin, Cout, H, W = 2, 4, 8, 16, 16
    key = jax.random.PRNGKey(0)
    kx, kwd, kbd, kwp, kbp = jax.random.split(key, 5)

    x = jax.random.normal(kx, (N, Cin, H, W), dtype=jnp.float32)
    # Deterministic synthetic parameters (shapes per nn.Conv2d in __init__):
    wd = jax.random.normal(kwd, (Cin, 1, 3, 3), dtype=jnp.float32) * 0.1
    bd = jax.random.normal(kbd, (Cin,), dtype=jnp.float32) * 0.1
    wp = jax.random.normal(kwp, (Cout, Cin, 1, 1), dtype=jnp.float32) * 0.1
    bp = jax.random.normal(kbp, (Cout,), dtype=jnp.float32) * 0.1

    # One-time weight packing (out of the hot path), then the jitted apply.
    packed = jax.block_until_ready(pack_params(wd, bd, wp, bp, W))
    out = dsconv_apply(x, *packed)
    out = jax.block_until_ready(out)

    ref = jax.block_until_ready(_reference(x, wd, bd, wp, bp))
    assert out.shape == (N, Cout, H, W), out.shape
    np.testing.assert_allclose(np.asarray(out), np.asarray(ref), atol=1e-4, rtol=1e-4)

    print("KERNEL_OK")
</pallas_src>

<mosaic_0001>
module attributes {stable_mosaic.version = 11 : i64} {
  func.func @_dsconv_kernel(%arg0: i32, %arg1: memref<16x64xf32, #tpu.memory_space<vmem>>, %arg2: memref<9x64xf32, #tpu.memory_space<vmem>>, %arg3: memref<64x128xf32, #tpu.memory_space<vmem>>, %arg4: memref<1x128xf32, #tpu.memory_space<vmem>>, %arg5: memref<16x128xf32, #tpu.memory_space<vmem>>, %arg6: memref<18x72xf32, #tpu.memory_space<vmem>>, %arg7: memref<16x64xf32, #tpu.memory_space<vmem>>) attributes {dimension_semantics = [#tpu.dimension_semantics<parallel>], iteration_bounds = array<i64: 2>, scalar_prefetch = 0 : i64, scratch_operands = 2 : i64, tpu.core_type = #tpu.core_type<tc>, window_params = [{transform_indices = @transform_0, window_bounds = array<i64: 16, 64>}, {pipeline_mode = #tpu.pipeline_mode<synchronous>, transform_indices = @transform_1, window_bounds = array<i64: 9, 64>}, {pipeline_mode = #tpu.pipeline_mode<synchronous>, transform_indices = @transform_2, window_bounds = array<i64: 64, 128>}, {pipeline_mode = #tpu.pipeline_mode<synchronous>, transform_indices = @transform_3, window_bounds = array<i64: 1, 128>}, {transform_indices = @transform_4, window_bounds = array<i64: 16, 128>}]} {
    %cst = arith.constant 0.000000e+00 : f32
    %0 = vector.broadcast %cst : f32 to vector<1x72xf32>
    %c0 = arith.constant 0 : index
    %c0_0 = arith.constant 0 : index
    %1 = vector.load %arg6[%c0, %c0_0] : memref<18x72xf32, #tpu.memory_space<vmem>>, vector<1x72xf32>
    tpu.vector_store %arg6[%c0, %c0_0], %0 {strides = array<i32>} : memref<18x72xf32, #tpu.memory_space<vmem>>, vector<1x72xf32>,
    %cst_1 = arith.constant 0.000000e+00 : f32
    %2 = vector.broadcast %cst_1 : f32 to vector<1x72xf32>
    %c17 = arith.constant 17 : index
    %c0_2 = arith.constant 0 : index
    %3 = vector.load %arg6[%c17, %c0_2] : memref<18x72xf32, #tpu.memory_space<vmem>>, vector<1x72xf32>
    tpu.vector_store %arg6[%c17, %c0_2], %2 {strides = array<i32>} : memref<18x72xf32, #tpu.memory_space<vmem>>, vector<1x72xf32>,
    %cst_3 = arith.constant 0.000000e+00 : f32
    %4 = vector.broadcast %cst_3 : f32 to vector<18x4xf32>
    %c0_4 = arith.constant 0 : index
    %c0_5 = arith.constant 0 : index
    %5 = vector.load %arg6[%c0_4, %c0_5] : memref<18x72xf32, #tpu.memory_space<vmem>>, vector<18x4xf32>
    tpu.vector_store %arg6[%c0_4, %c0_5], %4 {strides = array<i32>} : memref<18x72xf32, #tpu.memory_space<vmem>>, vector<18x4xf32>,
    %cst_6 = arith.constant 0.000000e+00 : f32
    %6 = vector.broadcast %cst_6 : f32 to vector<18x4xf32>
    %c0_7 = arith.constant 0 : index
    %c68 = arith.constant 68 : index
    %7 = vector.load %arg6[%c0_7, %c68] : memref<18x72xf32, #tpu.memory_space<vmem>>, vector<18x4xf32>
    tpu.vector_store %arg6[%c0_7, %c68], %6 {strides = array<i32>} : memref<18x72xf32, #tpu.memory_space<vmem>>, vector<18x4xf32>,
    %c0_8 = arith.constant 0 : index
    %c0_9 = arith.constant 0 : index
    %8 = vector.load %arg2[%c0_8, %c0_9] : memref<9x64xf32, #tpu.memory_space<vmem>>, vector<1x64xf32>
    %c1 = arith.constant 1 : index
    %c0_10 = arith.constant 0 : index
    %9 = vector.load %arg2[%c1, %c0_10] : memref<9x64xf32, #tpu.memory_space<vmem>>, vector<1x64xf32>
    %c2 = arith.constant 2 : index
    %c0_11 = arith.constant 0 : index
    %10 = vector.load %arg2[%c2, %c0_11] : memref<9x64xf32, #tpu.memory_space<vmem>>, vector<1x64xf32>
    %c3 = arith.constant 3 : index
    %c0_12 = arith.constant 0 : index
    %11 = vector.load %arg2[%c3, %c0_12] : memref<9x64xf32, #tpu.memory_space<vmem>>, vector<1x64xf32>
    %c4 = arith.constant 4 : index
    %c0_13 = arith.constant 0 : index
    %12 = vector.load %arg2[%c4, %c0_13] : memref<9x64xf32, #tpu.memory_space<vmem>>, vector<1x64xf32>
    %c5 = arith.constant 5 : index
    %c0_14 = arith.constant 0 : index
    %13 = vector.load %arg2[%c5, %c0_14] : memref<9x64xf32, #tpu.memory_space<vmem>>, vector<1x64xf32>
    %c6 = arith.constant 6 : index
    %c0_15 = arith.constant 0 : index
    %14 = vector.load %arg2[%c6, %c0_15] : memref<9x64xf32, #tpu.memory_space<vmem>>, vector<1x64xf32>
    %c7 = arith.constant 7 : index
    %c0_16 = arith.constant 0 : index
    %15 = vector.load %arg2[%c7, %c0_16] : memref<9x64xf32, #tpu.memory_space<vmem>>, vector<1x64xf32>
    %c8 = arith.constant 8 : index
    %c0_17 = arith.constant 0 : index
    %16 = vector.load %arg2[%c8, %c0_17] : memref<9x64xf32, #tpu.memory_space<vmem>>, vector<1x64xf32>
    %c0_i32 = arith.constant 0 : i32
    %c16_i32 = arith.constant 16 : i32
    %17 = arith.muli %c0_i32, %c16_i32 : i32
    %18 = tpu.assume_multiple %17, 8 : i32
    %19 = arith.index_cast %18 : i32 to index
    %c0_18 = arith.constant 0 : index
    %20 = vector.load %arg1[%19, %c0_18] : memref<16x64xf32, #tpu.memory_space<vmem>>, vector<16x64xf32>
    %c1_19 = arith.constant 1 : index
    %c4_20 = arith.constant 4 : index
    %21 = vector.load %arg6[%c1_19, %c4_20] : memref<18x72xf32, #tpu.memory_space<vmem>>, vector<16x64xf32>
    tpu.vector_store %arg6[%c1_19, %c4_20], %20 {strides = array<i32>} : memref<18x72xf32, #tpu.memory_space<vmem>>, vector<16x64xf32>,
    %cst_21 = arith.constant 0.000000e+00 : f32
    %22 = vector.broadcast %cst_21 : f32 to vector<16x64xf32>
    %c0_22 = arith.constant 0 : index
    %c0_23 = arith.constant 0 : index
    %23 = vector.load %arg6[%c0_22, %c0_23] : memref<18x72xf32, #tpu.memory_space<vmem>>, vector<16x64xf32>
    %24 = vector.broadcast %8 : vector<1x64xf32> to vector<16x64xf32>
    %25 = arith.mulf %23, %24 : vector<16x64xf32>
    %26 = arith.addf %22, %25 : vector<16x64xf32>
    %c0_24 = arith.constant 0 : index
    %c4_25 = arith.constant 4 : index
    %27 = vector.load %arg6[%c0_24, %c4_25] : memref<18x72xf32, #tpu.memory_space<vmem>>, vector<16x64xf32>
    %28 = vector.broadcast %9 : vector<1x64xf32> to vector<16x64xf32>
    %29 = arith.mulf %27, %28 : vector<16x64xf32>
    %30 = arith.addf %26, %29 : vector<16x64xf32>
    %c0_26 = arith.constant 0 : index
    %c8_27 = arith.constant 8 : index
    %31 = vector.load %arg6[%c0_26, %c8_27] : memref<18x72xf32, #tpu.memory_space<vmem>>, vector<16x64xf32>
    %32 = vector.broadcast %10 : vector<1x64xf32> to vector<16x64xf32>
    %33 = arith.mulf %31, %32 : vector<16x64xf32>
    %34 = arith.addf %30, %33 : vector<16x64xf32>
    %c1_28 = arith.constant 1 : index
    %c0_29 = arith.constant 0 : index
    %35 = vector.load %arg6[%c1_28, %c0_29] : memref<18x72xf32, #tpu.memory_space<vmem>>, vector<16x64xf32>
    %36 = vector.broadcast %11 : vector<1x64xf32> to vector<16x64xf32>
    %37 = arith.mulf %35, %36 : vector<16x64xf32>
    %38 = arith.addf %34, %37 : vector<16x64xf32>
    %c1_30 = arith.constant 1 : index
    %c4_31 = arith.constant 4 : index
    %39 = vector.load %arg6[%c1_30, %c4_31] : memref<18x72xf32, #tpu.memory_space<vmem>>, vector<16x64xf32>
    %40 = vector.broadcast %12 : vector<1x64xf32> to vector<16x64xf32>
    %41 = arith.mulf %39, %40 : vector<16x64xf32>
    %42 = arith.addf %38, %41 : vector<16x64xf32>
    %c1_32 = arith.constant 1 : index
    %c8_33 = arith.constant 8 : index
    %43 = vector.load %arg6[%c1_32, %c8_33] : memref<18x72xf32, #tpu.memory_space<vmem>>, vector<16x64xf32>
    %44 = vector.broadcast %13 : vector<1x64xf32> to vector<16x64xf32>
    %45 = arith.mulf %43, %44 : vector<16x64xf32>
    %46 = arith.addf %42, %45 : vector<16x64xf32>
    %c2_34 = arith.constant 2 : index
    %c0_35 = arith.constant 0 : index
    %47 = vector.load %arg6[%c2_34, %c0_35] : memref<18x72xf32, #tpu.memory_space<vmem>>, vector<16x64xf32>
    %48 = vector.broadcast %14 : vector<1x64xf32> to vector<16x64xf32>
    %49 = arith.mulf %47, %48 : vector<16x64xf32>
    %50 = arith.addf %46, %49 : vector<16x64xf32>
    %c2_36 = arith.constant 2 : index
    %c4_37 = arith.constant 4 : index
    %51 = vector.load %arg6[%c2_36, %c4_37] : memref<18x72xf32, #tpu.memory_space<vmem>>, vector<16x64xf32>
    %52 = vector.broadcast %15 : vector<1x64xf32> to vector<16x64xf32>
    %53 = arith.mulf %51, %52 : vector<16x64xf32>
    %54 = arith.addf %50, %53 : vector<16x64xf32>
    %c2_38 = arith.constant 2 : index
    %c8_39 = arith.constant 8 : index
    %55 = vector.load %arg6[%c2_38, %c8_39] : memref<18x72xf32, #tpu.memory_space<vmem>>, vector<16x64xf32>
    %56 = vector.broadcast %16 : vector<1x64xf32> to vector<16x64xf32>
    %57 = arith.mulf %55, %56 : vector<16x64xf32>
    %58 = arith.addf %54, %57 : vector<16x64xf32>
    %59 = arith.index_cast %18 : i32 to index
    %c0_40 = arith.constant 0 : index
    %60 = vector.load %arg7[%59, %c0_40] : memref<16x64xf32, #tpu.memory_space<vmem>>, vector<16x64xf32>
    tpu.vector_store %arg7[%59, %c0_40], %58 {strides = array<i32>} : memref<16x64xf32, #tpu.memory_space<vmem>>, vector<16x64xf32>,
    %c1_i32 = arith.constant 1 : i32
    %c0_41 = arith.constant 0 : index
    %c0_42 = arith.constant 0 : index
    %61 = vector.load %arg7[%c0_41, %c0_42] : memref<16x64xf32, #tpu.memory_space<vmem>>, vector<16x64xf32>
    %c0_43 = arith.constant 0 : index
    %c0_44 = arith.constant 0 : index
    %62 = vector.load %arg3[%c0_43, %c0_44] : memref<64x128xf32, #tpu.memory_space<vmem>>, vector<64x128xf32>
    %cst_45 = arith.constant dense<0.000000e+00> : vector<16x128xf32>
    %63 = tpu.matmul %61, %62, %cst_45 {dimension_numbers = #tpu.dot_dimension_numbers<[1], [0], [0], [1], [0, 0, 1, 1], [], []>} : vector<16x64xf32>, vector<64x128xf32>, vector<16x128xf32> -> vector<16x128xf32>
    %c0_46 = arith.constant 0 : index
    %c0_47 = arith.constant 0 : index
    %64 = vector.load %arg4[%c0_46, %c0_47] : memref<1x128xf32, #tpu.memory_space<vmem>>, vector<1x128xf32>
    %65 = vector.broadcast %64 : vector<1x128xf32> to vector<16x128xf32>
    %66 = arith.addf %63, %65 : vector<16x128xf32>
    %c0_48 = arith.constant 0 : index
    %c0_49 = arith.constant 0 : index
    %67 = vector.load %arg5[%c0_48, %c0_49] : memref<16x128xf32, #tpu.memory_space<vmem>>, vector<16x128xf32>
    tpu.vector_store %arg5[%c0_48, %c0_49], %66 {strides = array<i32>} : memref<16x128xf32, #tpu.memory_space<vmem>>, vector<16x128xf32>,
    return
  }
  func.func @transform_0(%arg0: i32) -> (i32, i32) {
    %c0_i32 = arith.constant 0 : i32
    %c0_i32_0 = arith.constant 0 : i32
    return %arg0, %c0_i32 : i32, i32
  }
  func.func @transform_1(%arg0: i32) -> (i32, i32) {
    %c0_i32 = arith.constant 0 : i32
    %c0_i32_0 = arith.constant 0 : i32
    %c0_i32_1 = arith.constant 0 : i32
    return %c0_i32, %c0_i32_0 : i32, i32
  }
  func.func @transform_2(%arg0: i32) -> (i32, i32) {
    %c0_i32 = arith.constant 0 : i32
    %c0_i32_0 = arith.constant 0 : i32
    %c0_i32_1 = arith.constant 0 : i32
    return %c0_i32, %c0_i32_0 : i32, i32
  }
  func.func @transform_3(%arg0: i32) -> (i32, i32) {
    %c0_i32 = arith.constant 0 : i32
    %c0_i32_0 = arith.constant 0 : i32
    %c0_i32_1 = arith.constant 0 : i32
    return %c0_i32, %c0_i32_0 : i32, i32
  }
  func.func @transform_4(%arg0: i32) -> (i32, i32) {
    %c0_i32 = arith.constant 0 : i32
    %c0_i32_0 = arith.constant 0 : i32
    return %arg0, %c0_i32 : i32, i32
  }
}

</mosaic_0001>

<bundles_post_ra>
// kernel: dsconv_apply.1
= control target key start
LH: loop header
LB: loop body
LE: loop exit
PB: predicated region body
PF: predicated region fallthrough
CT: control target
= control target key end

     0   :  { %s648_s15 = smov 0   ;;  %s753_s0 = inlined_call_operand.vmem [shape: f32[32,64], index: 0, kind: input, shape index: {}]   ;;  %s754_s1 = inlined_call_operand.vmem [shape: f32[9,64], index: 1, kind: input, shape index: {}]   ;;  %s755_s2 = inlined_call_operand.vmem [shape: f32[64,128], index: 2, kind: input, shape index: {}]   ;;  %s756_s3 = inlined_call_operand.vmem [shape: f32[1,128], index: 3, kind: input, shape index: {}]   ;;  %s757_s4 = inlined_call_operand.vmem [shape: f32[32,128], index: 4, kind: output, shape index: {}]  }
   0x1 LB: > { %s545_s16 = sadd.s32 4294967295, %s616_s15   ;;  %p549_p0 = scmp.ge.s32.totalorder %s616_s15, 1  ;;  %s616_s15 = sphi %s648_s15, %s14_s15  }
   0x2   : > { %p163_p1 = scmp.lt.s32.totalorder %s616_s15, 3 }
   0x4   : > { %p164_p2 = pnand %p549_p0, %p163_p1 }
   0x5   : > { %s550_s19 = sshll.u32 (!%p164_p2), %s545_s16, 1  ;;  %s618_s20 = smov (!%p164_p2), 4  }
   0x6   : > { %167 = sbr.rel (%p164_p2) target bundleno = 488 (0x1e8), region = 36  ;;  %p190_p3 = scmp.lt.s32.totalorder (!%p164_p2), %s550_s19, 3 }
   0x7   : > { %s620_s24 = smov (!%p164_p2), 8   ;;  %s621_s10 = smov (!%p164_p2), 124  }
   0x8   : > { %s622_s11 = smov (!%p164_p2), 120  }
   0xb   : > { %v555_v0 = vld [vmem:[%s754_s1 + $0x1] ss:$0 sm:$0xff]  ;;  %v556_v1 = vld [vmem:[%s754_s1 + $0x2] ss:$0 sm:$0xff]  ;;  %vm201_vm0 = vcmask 581632   ;;  %s759_s19 = smov (!%p190_p3, %s550_s19), 3 }
   0xc   : > { %251 = vrot.lane.b32.xlu1 %v555_v0, %s618_s20  ;;  %v619_v2 = vmov 0.0   ;;  %vm204_vm1 = vcmask 31744   ;;  %vm209_vm2 = vcmask 589344   ;;  %vm207_vm3 = vcmask 25600   ;;  %s551_s23 = sshll.u32 %s759_s19, 3  ;;  %v398_v20 = vld [vmem:[%s755_s2 + $0x38] sm:$0xff] }
   0xd   : > { %202 = vst.msk [vmem:[#allocation2] sm:$0x1] %vm201_vm0, %v619_v2  ;;  %203 = vst.msk [vmem:[#allocation2 + $0x11] sm:$0x1] %vm201_vm0, %v619_v2  ;;  %vm212_vm4 = vcmask 583200   ;;  %s193_s27 = scalar_lea.vmem %s753_s0, %s551_s23  ;;  %vm233_vm5 = vcmask 556064   ;;  %578 = vmatprep.subr.mxu0 %v398_v20  ;;  %s199_s16 = scalar_lea.vmem %s757_s4, %s551_s23 }
   0xe   : > { %205 = vst.msk [vmem:[#allocation2] sm:$0xff] %vm204_vm1, %v619_v2  ;;  %206 = vst.msk [vmem:[#allocation2 + $0x8] sm:$0xff] %vm204_vm1, %v619_v2  ;;  %v559_v3 = vld [vmem:[%s754_s1 + $0x5] ss:$0 sm:$0xff]  ;;  %v224_v5 = vld [vmem:[%s193_s27 + $0x8] sm:$0xff]  ;;  %579 = vmatpush3.msra.mxu0 %v398_v20  ;;  %vm386_vm6 = vcmask 523264  }
   0xf   : > { %208 = vst.msk [vmem:[#allocation2 + $0x10] sm:$0x3] %vm207_vm3, %v619_v2  ;;  %v223_v4 = vld [vmem:[%s193_s27] sm:$0xff]  ;;  %v562_v6 = vld [vmem:[%s754_s1 + $0x8] ss:$0 sm:$0xff]  ;;  %v397_v25 = vld [vmem:[%s755_s2 + $0x30] sm:$0xff] }
  0x10   : > { %271 = vrot.lane.b32.xlu1 %v556_v1, %s620_s24  ;;  %210 = vst.msk [vmem:[#allocation2] sm:$0xff] %vm209_vm2, %v619_v2  ;;  %211 = vst.msk [vmem:[#allocation2 + $0x8] sm:$0xff] %vm209_vm2, %v619_v2  ;;  %227 = vrot.lane.b32.xlu0 %v223_v4, %s618_s20  ;;  %v558_v7 = vld [vmem:[%s754_s1 + $0x4] ss:$0 sm:$0xff]  ;;  %v561_v8 = vld [vmem:[%s754_s1 + $0x7] ss:$0 sm:$0xff] }
  0x11   : > { %213 = vst.msk [vmem:[#allocation2 + $0x10] sm:$0x3] %vm212_vm4, %v619_v2  ;;  %580 = vmatprep.subr.mxu0 %v397_v25  ;;  %v396_v26 = vld [vmem:[%s755_s2 + $0x28] sm:$0xff]  ;;  %v395_v31 = vld [vmem:[%s755_s2 + $0x20] sm:$0xff]  ;;  %v394_v33 = vld [vmem:[%s755_s2 + $0x18] sm:$0xff] }
  0x12   : > { %581 = vmatpush3.msra.mxu0 %v397_v25  ;;  %v393_v34 = vld [vmem:[%s755_s2 + $0x10] sm:$0xff]  ;;  %v392_v38 = vld [vmem:[%s755_s2 + $0x8] sm:$0xff]  ;;  %v391_v40 = vld [vmem:[%s755_s2] sm:$0xff] }
  0x13   : > { %582 = vmatprep.subr.mxu0 %v396_v26  ;;  %v554_v43 = vld [vmem:[%s754_s1] ss:$0 sm:$0xff]  ;;  %v557_v46 = vld [vmem:[%s754_s1 + $0x3] ss:$0 sm:$0xff]  ;;  %v560_v59 = vld [vmem:[%s754_s1 + $0x6] ss:$0 sm:$0xff] }
  0x14   : > { %321 = vrot.lane.b32.xlu1 %v559_v3, %s620_s24  ;;  %229 = vrot.lane.b32.xlu0 %v224_v5, %s618_s20 }
  0x15   : > { %583 = vmatpush3.msra.mxu0 %v396_v26 }
  0x16   : > { %584 = vmatprep.subr.mxu0 %v395_v31 }
  0x17   : > { %585 = vmatpush3.msra.mxu0 %v395_v31 }
  0x18   : > { %371 = vrot.lane.b32.xlu1 %v562_v6, %s620_s24  ;;  %301 = vrot.lane.b32.xlu0 %v558_v7, %s618_s20 }
  0x19   : > { %586 = vmatprep.subr.mxu0 %v394_v33 }
  0x1a   : > { %587 = vmatpush3.msra.mxu0 %v394_v33 }
  0x1b   : > { %588 = vmatprep.subr.mxu0 %v393_v34 }
  0x1c   : > { %351 = vrot.lane.b32.xlu0 %v561_v8, %s618_s20  ;;  %589 = vmatpush3.msra.mxu0 %v393_v34 }
  0x1d   : > { %590 = vmatprep.subr.mxu0 %v392_v38 }
  0x1e   : > { %591 = vmatpush3.msra.mxu0 %v392_v38 }
  0x1f   : > { %592 = vmatprep.subr.mxu0 %v391_v40 }
  0x20   : > { %593 = vmatpush3.msra.mxu0 %v391_v40 }
  0x7e   : > { %v252_v11 = vpop.permute.xlu1 %251 }
  0x82   : > { %v228_v9 = vpop.permute.xlu0 %227  ;;  %v272_v14 = vpop.permute.xlu1 %271 }
  0x83   : > { %234 = vst.msk [vmem:[#allocation2 + $0x1] sm:$0xff] %vm233_vm5, %v228_v9 }
  0x86   : > { %v230_v10 = vpop.permute.xlu0 %229  ;;  %v322_v22 = vpop.permute.xlu1 %321 }
  0x87   : > { %235 = vst.msk [vmem:[#allocation2 + $0x9] sm:$0xff] %vm233_vm5, %v230_v10 }
  0x8a   : > { %v687_v12 = vld [vmem:[#allocation2] sm:$0xff]  ;;  %v302_v18 = vpop.permute.xlu0 %301  ;;  %v372_v36 = vpop.permute.xlu1 %371 }
  0x8b   : > { %v254_v13 = vmul.f32 %v252_v11, %v687_v12  ;;  %v274_v15 = vmul.f32 %v272_v14, %v687_v12  ;;  %v286_v17 = vld [vmem:[#allocation2 + $0x1] sm:$0xff]  ;;  %v242_v45 = vmul.f32 %v554_v43, %v687_v12 }
  0x8c   : > { %v304_v21 = vmul.f32 %v302_v18, %v286_v17  ;;  %v324_v27 = vmul.f32 %v322_v22, %v286_v17  ;;  %v292_v51 = vmul.f32 %v557_v46, %v286_v17 }
  0x8d   : > { %258 = vrot.lane.b32.xlu0 %v254_v13, %s621_s10 }
  0x8e   : > { %v692_v16 = vld [vmem:[#allocation2 + $0x8] sm:$0xff]  ;;  %v352_v30 = vpop.permute.xlu0 %351 }
  0x8f   : > { %v255_v19 = vmul.f32 %v252_v11, %v692_v16  ;;  %v275_v23 = vmul.f32 %v272_v14, %v692_v16  ;;  %v287_v24 = vld [vmem:[#allocation2 + $0x9] sm:$0xff]  ;;  %v243_v52 = vmul.f32 %v554_v43, %v692_v16 }
  0x90   : > { %v305_v28 = vmul.f32 %v302_v18, %v287_v24  ;;  %v336_v29 = vld [vmem:[#allocation2 + $0x2] sm:$0xff]  ;;  %v325_v35 = vmul.f32 %v322_v22, %v287_v24  ;;  %v337_v37 = vld [vmem:[#allocation2 + $0xa] sm:$0xff]  ;;  %v293_v58 = vmul.f32 %v557_v46, %v287_v24 }
  0x91   : > { %278 = vrot.lane.b32.xlu0 %v274_v15, %s622_s11  ;;  %260 = vrot.lane.b32.xlu1 %v255_v19, %s621_s10  ;;  %v354_v32 = vmul.f32 %v352_v30, %v336_v29  ;;  %v374_v39 = vmul.f32 %v372_v36, %v336_v29  ;;  %v355_v41 = vmul.f32 %v352_v30, %v337_v37  ;;  %v563_v19 = vld [vmem:[%s756_s3] ss:$0 sm:$0xff] }
  0x92   : > { %v375_v42 = vmul.f32 %v372_v36, %v337_v37  ;;  %v342_v1 = vmul.f32 %v560_v59, %v336_v29  ;;  %v343_v7 = vmul.f32 %v560_v59, %v337_v37 }
  0x95   : > { %308 = vrot.lane.b32.xlu0 %v304_v21, %s621_s10  ;;  %280 = vrot.lane.b32.xlu1 %v275_v23, %s622_s11 }
  0x99   : > { %328 = vrot.lane.b32.xlu0 %v324_v27, %s622_s11  ;;  %310 = vrot.lane.b32.xlu1 %v305_v28, %s621_s10 }
  0x9d   : > { %358 = vrot.lane.b32.xlu0 %v354_v32, %s621_s10  ;;  %330 = vrot.lane.b32.xlu1 %v325_v35, %s622_s11 }
  0xa1   : > { %378 = vrot.lane.b32.xlu0 %v374_v39, %s622_s11  ;;  %360 = vrot.lane.b32.xlu1 %v355_v41, %s621_s10 }
  0xa5   : > { %380 = vrot.lane.b32.xlu1 %v375_v42, %s622_s11 }
  0xff   : > { %v259_v44 = vpop.permute.xlu0 %258 }
 0x100   : > { %v264_v47 = vadd.f32 %v259_v44, %v242_v45 }
 0x103   : > { %v279_v48 = vpop.permute.xlu0 %278  ;;  %v261_v49 = vpop.permute.xlu1 %260 }
 0x104   : > { %v284_v50 = vadd.f32 %v279_v48, %v264_v47  ;;  %v265_v54 = vadd.f32 %v261_v49, %v243_v52 }
 0x106   : > { %v294_v53 = vadd.f32 %v292_v51, %v284_v50 }
 0x107   : > { %v309_v55 = vpop.permute.xlu0 %308  ;;  %v281_v56 = vpop.permute.xlu1 %280 }
 0x108   : > { %v285_v57 = vadd.f32 %v281_v56, %v265_v54  ;;  %v314_v60 = vadd.f32 %v309_v55, %v294_v53 }
 0x10a   : > { %v295_v61 = vadd.f32 %v293_v58, %v285_v57 }
 0x10b   : > { %v329_v62 = vpop.permute.xlu0 %328  ;;  %v311_v63 = vpop.permute.xlu1 %310 }
 0x10c   : > { %v334_v0 = vadd.f32 %v329_v62, %v314_v60  ;;  %v315_v3 = vadd.f32 %v311_v63, %v295_v61 }
 0x10e   : > { %v344_v2 = vadd.f32 %v342_v1, %v334_v0 }
 0x10f   : > { %v359_v4 = vpop.permute.xlu0 %358  ;;  %v331_v5 = vpop.permute.xlu1 %330 }
 0x110   : > { %v335_v6 = vadd.f32 %v331_v5, %v315_v3  ;;  %v364_v8 = vadd.f32 %v359_v4, %v344_v2 }
 0x112   : > { %v345_v9 = vadd.f32 %v343_v7, %v335_v6 }
 0x113   : > { %v379_v10 = vpop.permute.xlu0 %378  ;;  %v361_v11 = vpop.permute.xlu1 %360 }
 0x114   : > { %v384_v12 = vadd.f32 %v379_v10, %v364_v8  ;;  %v365_v13 = vadd.f32 %v361_v11, %v345_v9 }
 0x116   : > { %387 = vst.msk [vmem:[#allocation3] sm:$0xff] %vm386_vm6, %v384_v12 }
 0x117   : > { %v381_v14 = vpop.permute.xlu1 %380 }
 0x118   : > { %v385_v15 = vadd.f32 %v381_v14, %v365_v13 }
 0x11a   : > { %388 = vst.msk [vmem:[#allocation3 + $0x8] sm:$0xff] %vm386_vm6, %v385_v15 }
 0x11d   : > { %v389_v16 = vld [vmem:[#allocation3] sm:$0xff] }
 0x11e   : > { %594 = vmatprep.mubr.msk.f32.mxu0 %vm386_vm6, %v389_v16 }
 0x121   : > { %v390_v17 = vld [vmem:[#allocation3 + $0x8] sm:$0xff] }
 0x122   : > { %595 = vmatmul.mubr.msk.f32.vlgmr.msra.gmra.mxu0 %vm386_vm6, %v390_v17 }
 0x1e2   : > { %v596_v18 = vpop.f32.mrf.mxu0 }
 0x1e3   : > { %v484_v22 = vadd.f32 %v596_v18, %v563_v19 }
 0x1e4   : > { %v478_v20 = vpop.f32.mrf.mxu0 }
 0x1e5   : > { %v479_v21 = vadd.f32 %v563_v19, %v478_v20  ;;  %488 = vst [vmem:[%s199_s16 + $0x8] sm:$0xff] %v484_v22 }
 0x1e7   : > { %487 = vst [vmem:[%s199_s16] sm:$0xff] %v479_v21 }
 0x1e8 PF: > { %s14_s15 = sadd.s32 1, %s616_s15  }
 0x1e9   : > { %p11_p4 = scmp.ge.s32.totalorder %s14_s15, 4  }
 0x1eb   :  { %13 = sbr.rel (!%p11_p4) target bundleno = 1 (0x1), region = 66 }

</bundles_post_ra>
